<compile_context>
chip_gen: v7x
topology: tpu7x:2x2x1
jax: 0.10.0
libtpu: 0.0.40
codegen_flags: <defaults>
</compile_context>

<pallas_src>
import functools

import jax
import jax.numpy as jnp
from jax.experimental import pallas as pl
from jax.experimental.pallas import tpu as pltpu


_SUBLANE = 8           # f32 sublane tile (matmul outputs are f32, slices act on them)
_LANE = 128
_MAX_LANES = 32768     # hard cap on spatial tile width


def _round_up(x, m):
    return (x + m - 1) // m * m


def _sigmoid(z):
    # EUP-friendly, full f32 precision: one tanh (EUP slot) + two cheap VALU ops.
    return 0.5 * (jnp.tanh(0.5 * z) + 1.0)


def _highdiv_kernel(x_ref, w1f_ref, w2_ref, o_ref, *, order, inter_pad, channels,
                    fuse_second):
    # x_ref  : (C, TILE_S)                      channels on sublane, spatial on lane
    # w1f_ref: (NF*inter_pad, C)                fused first-stage weights (block cnt
    #                                           = W1[cnt]^T, zero-padded to 8 rows)
    # w2_ref : fused:  (order*C, order*inter_pad) block-diagonal, block j = W2[j]^T
    #          split:  (order*C, inter_pad)       row block j = W2[j]^T
    x = x_ref[...]                                       # stays in input dtype

    # --- single fused first-stage matmul: y^T = W1_fused @ x^T ----------------
    y_all = jnp.dot(w1f_ref[...], x, preferred_element_type=jnp.float32)

    # --- per-order products + relu (all slices are sublane-aligned) -----------
    y_parts = []
    cnt = 0
    for j in range(order):
        yt = y_all[cnt * inter_pad:(cnt + 1) * inter_pad, :]
        cnt += 1
        for _ in range(1, j + 1):
            yt = yt * y_all[cnt * inter_pad:(cnt + 1) * inter_pad, :]
            cnt += 1
        y_parts.append(jnp.maximum(yt, 0.0))             # F.relu

    # --- second stage + sigmoid ------------------------------------------------
    if fuse_second:
        y_relu = jnp.concatenate(y_parts, axis=0)        # (order*inter_pad, S)
        z = jnp.dot(w2_ref[...], y_relu, preferred_element_type=jnp.float32)
        sig = _sigmoid(z)                                # (order*C, S)
        acc = sig[0:channels, :]
        for j in range(1, order):
            acc = acc + sig[j * channels:(j + 1) * channels, :]
    else:
        acc = None
        for j in range(order):
            zj = jnp.dot(w2_ref[j * channels:(j + 1) * channels, :], y_parts[j],
                         preferred_element_type=jnp.float32)
            sj = _sigmoid(zj)
            acc = sj if acc is None else acc + sj

    # fold the 1/order constant into a multiply (no per-element divide)
    out = x.astype(jnp.float32) * (acc * (1.0 / order))
    o_ref[...] = out.astype(o_ref.dtype)


def _vmem_capacity_bytes():
    try:
        info = pltpu.get_tpu_info()
        cap = int(getattr(info, "vmem_capacity_bytes", 0))
        if cap > 0:
            return cap
    except Exception:
        pass
    return 64 * 1024 * 1024   # conservative: v7x per-TensorCore physical VMEM


def _pick_tile_s(hw_pad, n_batch, channels, nf, order, inter_pad, itemsize,
                 tile_budget_bytes):
    """Largest 128-multiple divisor of hw_pad that fits the VMEM byte budget."""
    # Bytes of VMEM per lane column of one spatial tile:
    #   2x double-buffered in+out blocks + f32 elementwise intermediates.
    io_bpl = 2 * 2 * channels * itemsize
    tmp_bpl = (nf * inter_pad + order * inter_pad + 2 * order * channels
               + channels) * 4
    bytes_per_lane = io_bpl + tmp_bpl
    max_lanes = max(_LANE, (tile_budget_bytes // bytes_per_lane) // _LANE * _LANE)
    cap = min(_MAX_LANES, max_lanes, hw_pad)
    cands = [t for t in range(_LANE, cap + 1, _LANE) if hw_pad % t == 0]
    if not cands:
        return _LANE if hw_pad % _LANE == 0 else hw_pad
    best = cands[-1]
    # Small-problem heuristic (megacore / pipelining): prefer >= 8 total grid
    # steps as long as tiles stay >= 512 lanes wide.
    if n_batch * (hw_pad // best) < 8:
        for t in reversed(cands):
            if t >= 512 and n_batch * (hw_pad // t) >= 8:
                best = t
                break
    return best


def highdiv_forward(x_nchw, w1, w2, *, order, tile_s=None):
    """x_nchw: (N, C, H, W).  w1: (NF, C, inter).  w2: (order, inter, C)."""
    N, C, H, W = x_nchw.shape
    HW = H * W
    nf, _, inter = w1.shape
    assert nf == order * (order + 1) // 2

    dtype = x_nchw.dtype
    itemsize = jnp.dtype(dtype).itemsize
    inter_pad = max(_SUBLANE, _round_up(inter, _SUBLANE))

    # ---- pack weights once on the host into the kernel's consumption layout ----
    # first stage: (NF, C, inter) -> (NF*inter_pad, C); block cnt = W1[cnt]^T,
    # rows [inter, inter_pad) zero-padded so per-order slices are sublane-aligned.
    w1t = jnp.transpose(w1, (0, 2, 1))                               # (NF, inter, C)
    w1t = jnp.pad(w1t, ((0, 0), (0, inter_pad - inter), (0, 0)))
    w1f = w1t.reshape(nf * inter_pad, C).astype(dtype)

    w2t = jnp.transpose(w2, (0, 2, 1))                               # (order, C, inter)
    w2t = jnp.pad(w2t, ((0, 0), (0, 0), (0, inter_pad - inter)))     # (order, C, inter_pad)

    # Fuse the second stage into one block-diagonal matmul only while it fits a
    # single MXU tile; otherwise do `order` exact-size dots inside the kernel.
    fuse_second = (order * C <= 128) and (C % _SUBLANE == 0)
    if fuse_second:
        w2k = jnp.zeros((order * C, order * inter_pad), w2.dtype)
        for j in range(order):
            w2k = w2k.at[j * C:(j + 1) * C,
                         j * inter_pad:(j + 1) * inter_pad].set(w2t[j])
    else:
        w2k = w2t.reshape(order * C, inter_pad)
    w2k = w2k.astype(dtype)

    # ---- NCHW is already (C, spatial)-major: reshape only, no transpose. ------
    # Pad the flattened spatial axis to a multiple of 128 for unmasked stores.
    hw_pad = _round_up(HW, _LANE)
    x3 = x_nchw.reshape(N, C, HW)
    if hw_pad != HW:
        x3 = jnp.pad(x3, ((0, 0), (0, 0), (0, hw_pad - HW)))

    vmem_cap = _vmem_capacity_bytes()
    vmem_limit = min(vmem_cap, 128 * 1024 * 1024) * 3 // 4
    if tile_s is None:
        tile_s = _pick_tile_s(hw_pad, N, C, nf, order, inter_pad, itemsize,
                              tile_budget_bytes=vmem_limit * 3 // 4)
    assert hw_pad % tile_s == 0, "padded spatial extent must be divisible by tile_s"

    kernel = functools.partial(_highdiv_kernel, order=order, inter_pad=inter_pad,
                               channels=C, fuse_second=fuse_second)
    out3 = pl.pallas_call(
        kernel,
        out_shape=jax.ShapeDtypeStruct((N, C, hw_pad), dtype),
        grid_spec=pltpu.PrefetchScalarGridSpec(
            num_scalar_prefetch=0,
            grid=(N, hw_pad // tile_s),
            in_specs=[
                # batch dim squeezed; kernel sees (C, tile_s)
                pl.BlockSpec((None, C, tile_s), lambda n, s: (n, 0, s)),
                pl.BlockSpec(w1f.shape, lambda n, s: (0, 0)),
                pl.BlockSpec(w2k.shape, lambda n, s: (0, 0)),
            ],
            out_specs=pl.BlockSpec((None, C, tile_s), lambda n, s: (n, 0, s)),
        ),
        compiler_params=pltpu.CompilerParams(
            dimension_semantics=("parallel", "parallel"),
            vmem_limit_bytes=int(vmem_limit),
        ),
    )(x3, w1f, w2k)

    if hw_pad != HW:
        out3 = out3[:, :, :HW]
    return out3.reshape(N, C, H, W)


def highdiv_reference(x_nchw, w1, w2, *, order):
    """Plain-JAX reference mirroring the PyTorch forward (for validation)."""
    N, C, H, W = x_nchw.shape
    xf = jnp.transpose(x_nchw, (0, 2, 3, 1)).reshape(-1, C).astype(jnp.float32)
    acc = jnp.zeros_like(xf)
    cnt = 0
    for j in range(order):
        yt = xf @ w1[cnt]
        cnt += 1
        for _ in range(1, j + 1):
            yt = yt * (xf @ w1[cnt])
            cnt += 1
        yt = jnp.maximum(yt, 0.0)
        acc = acc + jax.nn.sigmoid(yt @ w2[j])
    out = xf * acc / float(order)
    return jnp.transpose(out.reshape(N, H, W, C), (0, 3, 1, 2))


if __name__ == "__main__":
    # Module config (consistent with the PyTorch module: inter = C // 8 * 2 >= 1).
    in_channels = 16
    order = 2
    inter_channels = in_channels // 8 * 2          # = 4
    num_first = order * (order + 1) // 2           # number of orderX_j_i convs

    key = jax.random.PRNGKey(0)
    k_x, k_w1, k_w2 = jax.random.split(key, 3)

    # Input: NCHW, batch=2, channels=16, spatial=16x16
    x = jax.random.normal(k_x, (2, in_channels, 16, 16), dtype=jnp.float32)
    w1 = jax.random.normal(
        k_w1, (num_first, in_channels, inter_channels), dtype=jnp.float32) * 0.1
    w2 = jax.random.normal(
        k_w2, (order, inter_channels, in_channels), dtype=jnp.float32) * 0.1

    # f32 run: tight correctness check vs the plain-JAX reference.
    out = jax.block_until_ready(highdiv_forward(x, w1, w2, order=order))
    ref = highdiv_reference(x, w1, w2, order=order)
    assert out.shape == x.shape
    assert jnp.allclose(out, ref, atol=1e-5, rtol=1e-5), "f32 mismatch vs reference"

    # Spatial extent not divisible by 128 exercises the lane-padding path.
    x_odd = jax.random.normal(k_x, (2, in_channels, 12, 12), dtype=jnp.float32)
    out_odd = jax.block_until_ready(highdiv_forward(x_odd, w1, w2, order=order))
    ref_odd = highdiv_reference(x_odd, w1, w2, order=order)
    assert jnp.allclose(out_odd, ref_odd, atol=1e-5, rtol=1e-5), "padded-HW mismatch"

    # bf16 run: halves HBM traffic of this bandwidth-bound kernel (loose check).
    out_bf16 = jax.block_until_ready(
        highdiv_forward(x.astype(jnp.bfloat16), w1, w2, order=order))
    assert out_bf16.dtype == jnp.bfloat16
    assert float(jnp.max(jnp.abs(out_bf16.astype(jnp.float32) - ref))) < 0.1

    print("KERNEL_OK")
</pallas_src>

<mosaic_0001>
module attributes {stable_mosaic.version = 11 : i64} {
  func.func @_highdiv_kernel(%arg0: i32, %arg1: i32, %arg2: memref<1x16x256xf32, #tpu.memory_space<vmem>>, %arg3: memref<24x16xf32, #tpu.memory_space<vmem>>, %arg4: memref<32x16xf32, #tpu.memory_space<vmem>>, %arg5: memref<1x16x256xf32, #tpu.memory_space<vmem>>) attributes {dimension_semantics = [#tpu.dimension_semantics<parallel>, #tpu.dimension_semantics<parallel>], iteration_bounds = array<i64: 2, 1>, scalar_prefetch = 0 : i64, scratch_operands = 0 : i64, tpu.core_type = #tpu.core_type<tc>, window_params = [{transform_indices = @transform_0, window_bounds = array<i64: 1, 16, 256>}, {pipeline_mode = #tpu.pipeline_mode<synchronous>, transform_indices = @transform_1, window_bounds = array<i64: 24, 16>}, {pipeline_mode = #tpu.pipeline_mode<synchronous>, transform_indices = @transform_2, window_bounds = array<i64: 32, 16>}, {transform_indices = @transform_3, window_bounds = array<i64: 1, 16, 256>}]} {
    %c0 = arith.constant 0 : index
    %c0_0 = arith.constant 0 : index
    %c0_1 = arith.constant 0 : index
    %0 = vector.load %arg2[%c0, %c0_0, %c0_1] : memref<1x16x256xf32, #tpu.memory_space<vmem>>, vector<1x16x256xf32>
    %1 = vector.shape_cast %0 : vector<1x16x256xf32> to vector<16x256xf32>
    %c0_2 = arith.constant 0 : index
    %c0_3 = arith.constant 0 : index
    %2 = vector.load %arg3[%c0_2, %c0_3] : memref<24x16xf32, #tpu.memory_space<vmem>>, vector<24x16xf32>
    %cst = arith.constant dense<0.000000e+00> : vector<24x256xf32>
    %3 = tpu.matmul %2, %1, %cst {dimension_numbers = #tpu.dot_dimension_numbers<[1], [0], [0], [1], [0, 0, 1, 1], [], []>} : vector<24x16xf32>, vector<16x256xf32>, vector<24x256xf32> -> vector<24x256xf32>
    %4 = vector.extract_strided_slice %3 {offsets = [0, 0], sizes = [8, 256], strides = [1, 1]} : vector<24x256xf32> to vector<8x256xf32>
    %cst_4 = arith.constant 0.000000e+00 : f32
    %5 = vector.broadcast %cst_4 : f32 to vector<8x256xf32>
    %6 = arith.maximumf %4, %5 : vector<8x256xf32>
    %7 = vector.extract_strided_slice %3 {offsets = [8, 0], sizes = [8, 256], strides = [1, 1]} : vector<24x256xf32> to vector<8x256xf32>
    %8 = vector.extract_strided_slice %3 {offsets = [16, 0], sizes = [8, 256], strides = [1, 1]} : vector<24x256xf32> to vector<8x256xf32>
    %9 = arith.mulf %7, %8 : vector<8x256xf32>
    %cst_5 = arith.constant 0.000000e+00 : f32
    %10 = vector.broadcast %cst_5 : f32 to vector<8x256xf32>
    %11 = arith.maximumf %9, %10 : vector<8x256xf32>
    %12 = tpu.concatenate %6, %11 in 0 : vector<8x256xf32>, vector<8x256xf32> -> vector<16x256xf32>
    %c0_6 = arith.constant 0 : index
    %c0_7 = arith.constant 0 : index
    %13 = vector.load %arg4[%c0_6, %c0_7] : memref<32x16xf32, #tpu.memory_space<vmem>>, vector<32x16xf32>
    %cst_8 = arith.constant dense<0.000000e+00> : vector<32x256xf32>
    %14 = tpu.matmul %13, %12, %cst_8 {dimension_numbers = #tpu.dot_dimension_numbers<[1], [0], [0], [1], [0, 0, 1, 1], [], []>} : vector<32x16xf32>, vector<16x256xf32>, vector<32x256xf32> -> vector<32x256xf32>
    %cst_9 = arith.constant 5.000000e-01 : f32
    %15 = vector.broadcast %cst_9 : f32 to vector<32x256xf32>
    %16 = arith.mulf %15, %14 : vector<32x256xf32>
    %17 = math.tanh %16 : vector<32x256xf32>
    %cst_10 = arith.constant 1.000000e+00 : f32
    %18 = vector.broadcast %cst_10 : f32 to vector<32x256xf32>
    %19 = arith.addf %17, %18 : vector<32x256xf32>
    %cst_11 = arith.constant 5.000000e-01 : f32
    %20 = vector.broadcast %cst_11 : f32 to vector<32x256xf32>
    %21 = arith.mulf %20, %19 : vector<32x256xf32>
    %22 = vector.extract_strided_slice %21 {offsets = [0, 0], sizes = [16, 256], strides = [1, 1]} : vector<32x256xf32> to vector<16x256xf32>
    %23 = vector.extract_strided_slice %21 {offsets = [16, 0], sizes = [16, 256], strides = [1, 1]} : vector<32x256xf32> to vector<16x256xf32>
    %24 = arith.addf %22, %23 : vector<16x256xf32>
    %cst_12 = arith.constant 5.000000e-01 : f32
    %25 = vector.broadcast %cst_12 : f32 to vector<16x256xf32>
    %26 = arith.mulf %24, %25 : vector<16x256xf32>
    %27 = arith.mulf %1, %26 : vector<16x256xf32>
    %c0_13 = arith.constant 0 : index
    %c0_14 = arith.constant 0 : index
    %c0_15 = arith.constant 0 : index
    %28 = vector.load %arg5[%c0_13, %c0_14, %c0_15] : memref<1x16x256xf32, #tpu.memory_space<vmem>>, vector<1x16x256xf32>
    %29 = vector.shape_cast %28 : vector<1x16x256xf32> to vector<16x256xf32>
    %30 = vector.shape_cast %27 : vector<16x256xf32> to vector<1x16x256xf32>
    tpu.vector_store %arg5[%c0_13, %c0_14, %c0_15], %30 {strides = array<i32>} : memref<1x16x256xf32, #tpu.memory_space<vmem>>, vector<1x16x256xf32>,
    return
  }
  func.func @transform_0(%arg0: i32, %arg1: i32) -> (i32, i32, i32) {
    %c0_i32 = arith.constant 0 : i32
    %c0_i32_0 = arith.constant 0 : i32
    return %arg0, %c0_i32, %arg1 : i32, i32, i32
  }
  func.func @transform_1(%arg0: i32, %arg1: i32) -> (i32, i32) {
    %c0_i32 = arith.constant 0 : i32
    %c0_i32_0 = arith.constant 0 : i32
    %c0_i32_1 = arith.constant 0 : i32
    return %c0_i32, %c0_i32_0 : i32, i32
  }
  func.func @transform_2(%arg0: i32, %arg1: i32) -> (i32, i32) {
    %c0_i32 = arith.constant 0 : i32
    %c0_i32_0 = arith.constant 0 : i32
    %c0_i32_1 = arith.constant 0 : i32
    return %c0_i32, %c0_i32_0 : i32, i32
  }
  func.func @transform_3(%arg0: i32, %arg1: i32) -> (i32, i32, i32) {
    %c0_i32 = arith.constant 0 : i32
    %c0_i32_0 = arith.constant 0 : i32
    return %arg0, %c0_i32, %arg1 : i32, i32, i32
  }
}

</mosaic_0001>

<bundles_post_ra>
// kernel: tpu_custom_call.1
= control target key start
LH: loop header
LB: loop body
LE: loop exit
PB: predicated region body
PF: predicated region fallthrough
CT: control target
= control target key end

     0   :  { %8 = vsyncpa [#allocation3], 0  ;;  %s925_s0 = inlined_call_operand.vmem [shape: f32[2,16,256], index: 0, kind: input, shape index: {}]   ;;  %s926_s1 = inlined_call_operand.vmem [shape: f32[24,16], index: 1, kind: input, shape index: {}]   ;;  %s927_s2 = inlined_call_operand.vmem [shape: f32[32,16], index: 2, kind: input, shape index: {}]   ;;  %s928_s3 = inlined_call_operand.hbm [shape: f32[2,16,256], index: 3, kind: output, shape index: {}]  }
   0x1   :  { %10 = vsyncpa [#allocation3 + $0x1], 0  ;;  %s762_s12 = smov 0   ;;  %s764_s13 = smov 0  }
   0x2   :  { %s766_s14 = smov 0   ;;  %s768_s15 = smov 0  }
   0x3   :  { %s770_s16 = smov 0   ;;  %s772_s17 = smov 0  }
   0x4 LB: > { %s554_s18 = sadd.s32 4294967295, %s736_s17   ;;  %s555_s19 = sadd.s32 4294967294, %s736_s17   ;;  %s736_s17 = sphi %s772_s17, %s16_s17   ;;  %s732_s16 = sphi %s770_s16, %s935_s16   ;;  %s728_s15 = sphi %s768_s15, %s934_s15   ;;  %s724_s14 = sphi %s766_s14, %s933_s14   ;;  %s720_s13 = sphi %s764_s13, %s932_s13   ;;  %s716_s12 = sphi %s762_s12, %s931_s12  }
   0x5   : > { %s28_s20 = sadd.s32 1, %s732_s16  ;;  %s107_s21 = sadd.s32 1, %s724_s14 }
   0x6   : > { %p30_p0 = scmp.ge.s32.totalorder %s28_s20, 2  ;;  %p117_p1 = scmp.ne.s32.totalorder %s724_s14, %s720_s13 }
   0x7   : > { %p118_p2 = scmp.eq.s32.totalorder %s554_s18, 1  ;;  %p123_p3 = scmp.ne.s32.totalorder %s720_s13, %s716_s12 }
   0x8   : > { %s937_s20 = smov (%p30_p0, %s28_s20), 0  ;;  %p124_p5 = scmp.eq.s32.totalorder %s555_s19, 1 }
   0x9   : > { %p802_p4 = por %p118_p2, %p117_p1  ;;  %s102_s23 = ssub.s32 %s732_s16, %s937_s20 }
   0xa   : > { %p558_p6 = scmp.ge.s32.totalorder %s736_s17, 1  ;;  %p105_p7 = scmp.eq.s32.totalorder %s102_s23, 0 }
   0xb   : > { %p809_p8 = por %p124_p5, %p123_p3  ;;  %p161_p9 = scmp.lt.s32.totalorder %s736_s17, 3 }
   0xc   : > { %s815_s25 = scalar_select %p105_p7, %s724_s14, %s107_s21  }
   0xd   : > { %p162_p10 = pnand %p558_p6, %p161_p9 }
   0xe   : > { %p190_p11 = scmp.lt.s32.totalorder (!%p162_p10), %s728_s15, 1  ;;  %v738_v0 = vmov (!%p162_p10), 0.0   ;;  %v204_v7 = vld [vmem:[%s926_s1] sm:$0xff] (!%p162_p10)  ;;  %vm207_vm0 = vcmask (!%p162_p10), 130048   ;;  %v205_v8 = vld [vmem:[%s926_s1 + $0x8] sm:$0xff] (!%p162_p10)  ;;  %v206_v9 = vld [vmem:[%s926_s1 + $0x10] sm:$0xff] (!%p162_p10) }
   0xf   : > { %165 = sbr.rel (%p162_p10) target bundleno = 527 (0x20f), region = 32  ;;  %281 = vmatprep.mubr.f32.mxu0 (!%p162_p10), %v738_v0  ;;  %386 = vmatprep.mubr.f32.mxu1 (!%p162_p10), %v738_v0  ;;  %v306_v24 = vld [vmem:[%s927_s2] sm:$0xff] (!%p162_p10)  ;;  %v307_v25 = vld [vmem:[%s927_s2 + $0x8] sm:$0xff] (!%p162_p10)  ;;  %v308_v26 = vld [vmem:[%s927_s2 + $0x10] sm:$0xff] (!%p162_p10)  ;;  %s186_s28 = sand.u32 (!%p162_p10), 1, %s720_s13  }
  0x10   : > { %v309_v27 = vld [vmem:[%s927_s2 + $0x18] sm:$0xff] (!%p162_p10)  ;;  %s559_s29 = sshll.u32 (!%p162_p10), %s186_s28, 5  ;;  %s739_s10 = smov (!%p162_p10), [#allocation2]  }
  0x11   : > { %s188_s4 = scalar_lea.vmem (!%p162_p10), [#allocation2], %s559_s29  ;;  %s662_s11 = sshll.u32 (!%p162_p10), %s739_s10, 4  ;;  %s663_s11 = int_to_ptr.vmem [resolvable:$false] %s662_s11 }
  0x12   : > { %s475_s5 = sshll.u32 (!%p162_p10), %s188_s4, 4  ;;  %s664_s18 = scalar_lea.vmem (!%p162_p10), %s663_s11, 1024  ;;  %s874_s5 = int_to_ptr.vmem [resolvable:$true] %s475_s5 }
  0x13   : > { %s658_s9 = scalar_lea.vmem (!%p162_p10), %s874_s5, 512  ;;  %p665_p1 = scmp.lt.s32.totalorder (!%p162_p10), %s874_s5, %s663_s11 }
  0x14   : > { %p659_p12 = scmp.ne.s32.totalorder (!%p162_p10), %s874_s5, %s658_s9  ;;  %p666_p2 = scmp.lt.s32.totalorder (!%p162_p10), %s664_s18, %s658_s9 }
  0x16   : > { %s191_s26 = scalar_select %p190_p11, %s728_s15, 1 }
  0x17   : > { %p660_p13 = pnand %p659_p12, %p802_p4  ;;  %p667_p3 = por %p666_p2, %p665_p1 }
  0x18   : > { %s574_s27 = sshll.u32 %s191_s26, 5 }
  0x19   : > { %s197_s30 = scalar_lea.vmem %s925_s0, %s574_s27  ;;  %p661_p0 = pneg %p660_p13 }
  0x1a   : > { %v822_v1 = vld [vmem:[%s197_s30 + $0x8] sm:$0xff]  ;;  %v824_v2 = vld [vmem:[%s197_s30 + $0x18] sm:$0xff]  ;;  %v826_v3 = vld [vmem:[%s197_s30] sm:$0xff] }
  0x1b   : > { %v576_v4 = vpack.c.bf16 %v824_v2, %v822_v1  ;;  %v830_v5 = vld [vmem:[%s197_s30 + $0x10] sm:$0xff]  ;;  %s575_s30 = sshll.u32 %s728_s15, 9  ;;  %s879_s15 = scalar_lea.sflag [#allocation3], %s186_s28 }
  0x1c   : > { %v578_v6 = vpack.c.bf16 %v830_v5, %v826_v3  ;;  %s872_s8 = scalar_lea.hbm %s928_s3, %s575_s30  ;;  %p668_p5 = pnand %p667_p3, %p661_p0 }
  0x1d   : > { %577 = vmatprep.subr.bf16.mxu0 %v576_v4 }
  0x1e   : > { %579 = vmatpush1.bf16.msra.mxu0 %v578_v6 }
  0x21   : > { %562 = vmatmul.mubr.msk.f32.vlgmr.msra.gmra.mrb[0].mxu0 %vm207_vm0, %v204_v7 }
  0x22   : > { %287 = vmatprep.mubr.f32.mxu0 %v738_v0 }
  0x25   : > { %563 = vmatmul.mubr.msk.f32.gmra.mrb[2].mxu0 %vm207_vm0, %v205_v8 }
  0x26   : > { %293 = vmatprep.mubr.f32.mxu0 %v738_v0 }
  0x29   : > { %564 = vmatmul.mubr.msk.f32.gmra.mrb[4].mxu0 %vm207_vm0, %v206_v9 }
  0xf4   : > { %v283_v10 = vpop.f32.mrb[0].mxu0 }
  0xf5   : > { %v285_v11 = vpop.f32.mrb[1].mxu0  ;;  %v300_v18 = vmax.f32 %v283_v10, 0.0 }
  0xf6   : > { %v301_v20 = vmax.f32 %v285_v11, 0.0 }
  0xf8   : > { %v289_v12 = vpop.f32.mrb[2].mxu0 }
  0xf9   : > { %v291_v13 = vpop.f32.mrb[3].mxu0 }
  0xfc   : > { %v295_v14 = vpop.f32.mrb[4].mxu0 }
  0xfd   : > { %v302_v15 = vmul.f32 %v295_v14, %v289_v12  ;;  %v297_v16 = vpop.f32.mrb[5].mxu0 }
  0xfe   : > { %v303_v17 = vmul.f32 %v297_v16, %v291_v13 }
  0xff   : > { %v304_v19 = vmax.f32 %v302_v15, 0.0 }
 0x100   : > { %v305_v21 = vmax.f32 %v303_v17, 0.0 }
 0x101   : > { %v582_v22 = vpack.c.bf16 %v304_v19, %v300_v18 }
 0x102   : > { %v580_v23 = vpack.c.bf16 %v305_v21, %v301_v20 }
 0x104   : > { %581 = vmatprep.subr.bf16.mxu1 %v580_v23 }
 0x105   : > { %583 = vmatpush1.bf16.msra.mxu1 %v582_v22 }
 0x108   : > { %565 = vmatmul.mubr.msk.f32.vlgmr.msra.gmra.mrb[0].mxu1 %vm207_vm0, %v306_v24 }
 0x109   : > { %392 = vmatprep.mubr.f32.mxu1 %v738_v0 }
 0x10c   : > { %566 = vmatmul.mubr.msk.f32.gmra.mrb[2].mxu1 %vm207_vm0, %v307_v25 }
 0x10d   : > { %398 = vmatprep.mubr.f32.mxu1 %v738_v0 }
 0x110   : > { %567 = vmatmul.mubr.msk.f32.gmra.mrb[4].mxu1 %vm207_vm0, %v308_v26 }
 0x111   : > { %404 = vmatprep.mubr.f32.mxu1 %v738_v0 }
 0x114   : > { %568 = vmatmul.mubr.msk.f32.gmra.mrb[6].mxu1 %vm207_vm0, %v309_v27 }
 0x1db   : > { %v388_v28 = vpop.f32.mrb[0].mxu1 }
 0x1dc   : > { %v390_v29 = vpop.f32.mrb[1].mxu1  ;;  %v411_v30 = vmul.f32 0.5, %v388_v28 }
 0x1dd   : > { %v412_v31 = vmul.f32 0.5, %v390_v29 }
 0x1de   : > { %642 = vtanh.f32 %v411_v30 }
 0x1df   : > { %v394_v32 = vpop.f32.mrb[2].mxu1  ;;  %644 = vtanh.f32 %v412_v31 }
 0x1e0   : > { %v413_v33 = vmul.f32 0.5, %v394_v32  ;;  %v396_v34 = vpop.f32.mrb[3].mxu1 }
 0x1e1   : > { %v414_v35 = vmul.f32 0.5, %v396_v34 }
 0x1e2   : > { %646 = vtanh.f32 %v413_v33 }
 0x1e3   : > { %v400_v36 = vpop.f32.mrb[4].mxu1  ;;  %648 = vtanh.f32 %v414_v35 }
 0x1e4   : > { %v415_v37 = vmul.f32 0.5, %v400_v36  ;;  %v402_v38 = vpop.f32.mrb[5].mxu1 }
 0x1e5   : > { %v416_v39 = vmul.f32 0.5, %v402_v38 }
 0x1e6   : > { %650 = vtanh.f32 %v415_v37 }
 0x1e7   : > { %652 = vtanh.f32 %v416_v39  ;;  %v406_v40 = vpop.f32.mrb[6].mxu1 }
 0x1e8   : > { %v417_v41 = vmul.f32 0.5, %v406_v40  ;;  %v408_v42 = vpop.f32.mrb[7].mxu1  ;;  %v643_v44 = vpop.eup %642 }
 0x1e9   : > { %v418_v43 = vmul.f32 0.5, %v408_v42  ;;  %v645_v45 = vpop.eup %644  ;;  %v427_v48 = vadd.f32 1.0, %v643_v44 }
 0x1ea   : > { %654 = vtanh.f32 %v417_v41  ;;  %v428_v50 = vadd.f32 1.0, %v645_v45 }
 0x1eb   : > { %656 = vtanh.f32 %v418_v43  ;;  %v435_v54 = vmul.f32 0.5, %v427_v48 }
 0x1ec   : > { %v647_v46 = vpop.eup %646  ;;  %v436_v58 = vmul.f32 0.5, %v428_v50 }
 0x1ed   : > { %v649_v47 = vpop.eup %648  ;;  %v429_v55 = vadd.f32 1.0, %v647_v46 }
 0x1ee   : > { %v430_v59 = vadd.f32 1.0, %v649_v47 }
 0x1ef   : > { %v437_v6 = vmul.f32 0.5, %v429_v55 }
 0x1f0   : > { %v651_v49 = vpop.eup %650  ;;  %v438_v9 = vmul.f32 0.5, %v430_v59 }
 0x1f1   : > { %v653_v51 = vpop.eup %652  ;;  %v431_v52 = vadd.f32 1.0, %v651_v49 }
 0x1f2   : > { %v432_v53 = vadd.f32 1.0, %v653_v51 }
 0x1f3   : > { %v439_v56 = vmul.f32 0.5, %v431_v52 }
 0x1f4   : > { %v655_v57 = vpop.eup %654  ;;  %v440_v60 = vmul.f32 0.5, %v432_v53 }
 0x1f5   : > { %v657_v61 = vpop.eup %656  ;;  %v443_v62 = vadd.f32 %v439_v56, %v435_v54  ;;  %v433_v63 = vadd.f32 1.0, %v655_v57 }
 0x1f6   : > { %v444_v0 = vadd.f32 %v440_v60, %v436_v58  ;;  %v434_v4 = vadd.f32 1.0, %v657_v61 }
 0x1f7   : > { %v447_v7 = vmul.f32 0.5, %v443_v62  ;;  %v441_v8 = vmul.f32 0.5, %v433_v63 }
 0x1f8   : > { %v448_v10 = vmul.f32 0.5, %v444_v0  ;;  %v442_v11 = vmul.f32 0.5, %v434_v4 }
 0x1f9   : > { %v451_v12 = vmul.f32 %v447_v7, %v826_v3  ;;  %v445_v13 = vadd.f32 %v441_v8, %v437_v6 }
 0x1fa   : > { %v452_v14 = vmul.f32 %v448_v10, %v822_v1  ;;  %v446_v15 = vadd.f32 %v442_v11, %v438_v9 }
 0x1fb   : > { %455 = vst [vmem:[%s188_s4] sm:$0xff] %v451_v12  ;;  %v449_v16 = vmul.f32 0.5, %v445_v13 }
 0x1fc   : > { %456 = vst [vmem:[%s188_s4 + $0x8] sm:$0xff] %v452_v14  ;;  %v450_v17 = vmul.f32 0.5, %v446_v15 }
 0x1fd   : > { %v453_v18 = vmul.f32 %v449_v16, %v830_v5 }
 0x1fe   : > { %v454_v1 = vmul.f32 %v450_v17, %v824_v2 }
 0x1ff   : > { %457 = vst [vmem:[%s188_s4 + $0x10] sm:$0xff] %v453_v18 }
 0x200   : > { %458 = vst [vmem:[%s188_s4 + $0x18] sm:$0xff] %v454_v1 }
 0x201   : > { %671 = shalt.err (!%p668_p5)
}
 0x202   : > { %s672_s19 = scalar_lea.hbm %s872_s8, 512  ;;  %s676_s26 = scalar_lea.hbm %s928_s3, 1024 }
 0x203   : > { %p673_p6 = scmp.ne.s32.totalorder %s872_s8, %s672_s19  ;;  %p677_p10 = scmp.lt.u32.totalorder %s872_s8, %s928_s3 }
 0x204   : > { %p678_p11 = scmp.lt.u32.totalorder %s676_s26, %s672_s19  ;;  %p680_p13 = scmp.lt.u32.totalorder %s672_s19, %s872_s8 }
 0x205   : > { %p674_p7 = pnand %p673_p6, %p802_p4 }
 0x206   : > { %p679_p12 = por %p678_p11, %p677_p10 }
 0x207   : > { %p675_p9 = pneg %p674_p7 }
 0x208   : > { %p681_p0 = por %p680_p13, %p679_p12 }
 0x20a   : > { %p682_p1 = pnand %p681_p0, %p675_p9 }
 0x20c   : > { %685 = shalt.err (!%p682_p1)
}
 0x20d   : > { %s740_s29 = smov 256   ;;  %s741_s30 = smov 16  }
 0x20e   : > { %584 = dma.vmem_to_hbm [thread:$0]  (%p802_p4), %s874_s5, 512, %s872_s8, %s879_s15, %s740_s29, %s740_s29, %s741_s30  }
 0x20f PF: > { %p590_p2 = scmp.ge.s32.totalorder %s736_s17, 2  ;;  %s490_s4 = sand.u32 1, %s716_s12  }
 0x210   : > { %s491_s6 = scalar_lea.sflag [#allocation3], %s490_s4 }
 0x211   : > { %p587_p3 = pnand %p590_p2, %p809_p8 }
 0x213   : > { %711 = dma.done.wait (!%p587_p3), %s491_s6, 512  }
 0x214   : > { %713 = vsyncadd (!%p587_p3), %s491_s6, 4294966784  ;;  %s16_s17 = sadd.s32 1, %s736_s17   ;;  %s931_s12 = smov %s720_s13 }
 0x215   : > { %p13_p5 = scmp.ge.s32.totalorder %s16_s17, 4   ;;  %s932_s13 = smov %s724_s14 }
 0x216   : > { %s933_s14 = smov %s815_s25  ;;  %s934_s15 = smov %s732_s16 }
 0x217   : > { %s935_s16 = smov %s937_s20  ;;  %15 = sbr.rel (!%p13_p5) target bundleno = 4 (0x4), region = 67 }
 0x21e   :  { %496 = vsyncpa [#allocation3], 1 }
 0x21f   :  { %498 = vsyncpa [#allocation3 + $0x1], 1 }

</bundles_post_ra>
